<compile_context>
chip_gen: v6e
topology: v6e:2x2x1
jax: 0.10.0
libtpu: 0.0.40
codegen_flags: <defaults>
</compile_context>

<pallas_src>
from functools import partial

import numpy as np
import jax
import jax.numpy as jnp
from jax.experimental import pallas as pl
from jax.experimental.pallas import tpu as pltpu

CNNL_DIM_MAX = 8

_LANES = 128
_SUBLANES = 8
_MAX_COL_TILES = 64            # cols <= 64 * 128 = 8192 lanes


# ---------------------------------------------------------------------------
# View-chain parameter generation: 1:1 port of the PyTorch reference, operating
# on plain shape tuples with the identical numpy global-RNG call order, so
# np.random.seed(seed) makes the whole chain deterministic.
# ---------------------------------------------------------------------------
def get_permute_parameter(ndim):
    dim_vec = np.arange(ndim)
    np.random.shuffle(dim_vec)
    return tuple(int(d) for d in dim_vec)


def get_expand_parameter(shape, axis_num):
    tensor_dim = len(shape)
    if tensor_dim + axis_num >= CNNL_DIM_MAX:
        axis_num = CNNL_DIM_MAX - tensor_dim
    expand_parameter = list(shape)
    max_dim_value = max(expand_parameter) + 2
    expand_dim_num = 0
    for i in range(tensor_dim):
        if expand_parameter[i] == 1:
            expand_parameter[i] = int(np.random.randint(1, max_dim_value))
            expand_dim_num += 1
    while expand_dim_num < axis_num:
        expand_parameter.insert(0, expand_dim_num + 1)
        expand_dim_num += 1
    return tuple(int(s) for s in expand_parameter)


def get_select_parameter(shape):
    tensor_size = list(shape)
    dim_value = 1
    flag = 0
    if len(tensor_size) == 0:
        return (0, 0)
    dim = int(np.random.randint(0, len(tensor_size)))
    while dim_value <= 1 and flag < len(tensor_size):
        dim = 0 if dim == len(tensor_size) - 1 else dim + 1
        dim_value = tensor_size[dim]
        flag += 1
    if dim_value == 1:
        return (0, 0)
    index = int(np.random.randint(1, dim_value))
    return (int(dim), int(index))


# ---------------------------------------------------------------------------
# Hardware-generation-aware sizing.
# ---------------------------------------------------------------------------
def _hw_config():
    kind = ""
    try:
        kind = jax.devices()[0].device_kind.lower()
    except Exception:
        pass
    if "v5 lite" in kind or "v5e" in kind or "v5lite" in kind:
        # v5e: default scoped VMEM is 16 MiB -> 2 MiB blocks (8 MiB resident).
        return dict(block_bytes=2 << 20, single_block_bytes=4 << 20,
                    min_grid_blocks=1, vmem_limit=None)
    if "v6" in kind:
        # v6e: 32 MiB default scoped VMEM -> 4 MiB blocks, skip grid up to 8 MiB.
        return dict(block_bytes=4 << 20, single_block_bytes=8 << 20,
                    min_grid_blocks=1, vmem_limit=None)
    if "7" in kind:
        # v7x: 2 TensorCores, 64 MiB physical VMEM.  Force >=2 parallel grid
        # steps for non-trivial slabs; explicit (safe) vmem limit.
        return dict(block_bytes=4 << 20, single_block_bytes=512 << 10,
                    min_grid_blocks=2, vmem_limit=32 << 20)
    # Unknown / older generation: conservative.
    return dict(block_bytes=2 << 20, single_block_bytes=2 << 20,
                min_grid_blocks=1, vmem_limit=None)


# ---------------------------------------------------------------------------
# Pallas kernel: elementwise x + 1 on a lane-dense slab.
# ---------------------------------------------------------------------------
def _add_one_kernel(x_ref, o_ref):
    o_ref[...] = x_ref[...] + jnp.asarray(1, dtype=o_ref.dtype)


def _largest_divisor(n, cap):
    """Largest divisor of n that is <= cap (n >= 1, cap >= 1)."""
    for c in range(min(n, cap), 0, -1):
        if n % c == 0:
            return c
    return 1


def _round_up(n, m):
    return ((n + m - 1) // m) * m


def _add_one_single_block(arr2d):
    """Whole-array single-block +1 (no grid machinery)."""
    return pl.pallas_call(
        _add_one_kernel,
        out_shape=jax.ShapeDtypeStruct(arr2d.shape, arr2d.dtype),
        input_output_aliases={0: 0},
    )(arr2d)


def _add_one_slab(slab):
    """+1 on a (rows, cols) slab, cols a multiple of 128."""
    rows, cols = slab.shape
    itemsize = jnp.dtype(slab.dtype).itemsize
    cfg = _hw_config()
    total_bytes = rows * cols * itemsize

    if total_bytes <= cfg["single_block_bytes"] or rows <= _SUBLANES:
        return _add_one_single_block(slab)

    # Fixed target block size; ragged final block is masked by Pallas (cdiv grid).
    block_rows = max(_SUBLANES,
                     (cfg["block_bytes"] // (cols * itemsize)) // _SUBLANES * _SUBLANES)
    if cfg["min_grid_blocks"] > 1:
        # Ensure at least `min_grid_blocks` grid steps (v7x: shard across 2 TCs).
        cap = max(_SUBLANES, _round_up(pl.cdiv(rows, cfg["min_grid_blocks"]), _SUBLANES))
        block_rows = min(block_rows, cap)
    block_rows = min(block_rows, _round_up(rows, _SUBLANES))

    grid = (pl.cdiv(rows, block_rows),)

    cp_kwargs = dict(dimension_semantics=("parallel",))
    if cfg["vmem_limit"] is not None:
        cp_kwargs["vmem_limit_bytes"] = cfg["vmem_limit"]

    return pl.pallas_call(
        _add_one_kernel,
        out_shape=jax.ShapeDtypeStruct((rows, cols), slab.dtype),
        grid=grid,
        in_specs=[pl.BlockSpec((block_rows, cols), lambda i: (i, 0))],
        out_specs=pl.BlockSpec((block_rows, cols), lambda i: (i, 0)),
        input_output_aliases={0: 0},
        compiler_params=pltpu.CompilerParams(**cp_kwargs),
    )(slab)


def pallas_add_one(x):
    """Elementwise +1 on an arbitrarily-shaped array via Pallas TPU kernels."""
    orig_shape = x.shape
    n = int(np.prod(orig_shape)) if len(orig_shape) else 1
    if n == 0:
        return x

    if n % _LANES == 0:
        # Hot path: metadata-only reshape into a lane-dense slab (no pad/copy).
        # cols is the widest multiple of 128 that divides n (capped); even the
        # minimum cols=128 keeps vector stores full-lane / unmasked.
        cols = _LANES * _largest_divisor(n // _LANES, _MAX_COL_TILES)
        slab = jnp.reshape(x, (n // cols, cols))
        return jnp.reshape(_add_one_slab(slab), orig_shape)

    # Rare fallback (element count not a multiple of 128): process the
    # lane-aligned prefix with the fast slab path and the <128-element tail
    # with a tiny full-block kernel (no whole-array pad + slice copies).
    flat = jnp.reshape(x, (-1,))
    n_main = (n // _LANES) * _LANES
    tail = _add_one_single_block(jnp.reshape(flat[n_main:], (1, n - n_main)))
    if n_main == 0:
        return jnp.reshape(tail, orig_shape)
    cols = _LANES * _largest_divisor(n_main // _LANES, _MAX_COL_TILES)
    main = _add_one_slab(jnp.reshape(flat[:n_main], (n_main // cols, cols)))
    y = jnp.concatenate([jnp.reshape(main, (-1,)), jnp.reshape(tail, (-1,))])
    return jnp.reshape(y, orig_shape)


# ---------------------------------------------------------------------------
# ViewChain1 forward: Pallas compute (+1) + jitted metadata view-op glue.
# ---------------------------------------------------------------------------
@partial(jax.jit, static_argnums=(1, 2, 3, 4))
def _view_chain1_device(x, perm, expand_shape, dim, index):
    # +1 commutes with permute / expand / select -> run the kernel on the
    # still-contiguous input buffer, then apply the view chain as metadata ops.
    y = pallas_add_one(x)
    y = jnp.transpose(y, perm)
    y = jnp.broadcast_to(y, expand_shape)
    if len(expand_shape) != 0:
        y = jnp.take(y, index, axis=dim)   # scalar index drops the axis (== torch.select)
    return y


def view_chain1_forward(x, seed=0):
    np.random.seed(seed)   # makes the random view-chain deterministic

    # Same RNG call order as the PyTorch module: permute -> axis_num -> expand -> select.
    perm = get_permute_parameter(x.ndim)
    shape_p = tuple(int(x.shape[i]) for i in perm)
    axis_num = int(np.random.randint(0, 2))
    expand_shape = get_expand_parameter(shape_p, axis_num)
    dim, index = get_select_parameter(expand_shape)

    return _view_chain1_device(x, perm, expand_shape, dim, index)


if __name__ == "__main__":
    key = jax.random.PRNGKey(0)
    x = jax.random.normal(key, (2, 4, 16, 16), dtype=jnp.float32)   # NCHW
    x_np = np.asarray(x)

    out = view_chain1_forward(x, seed=0)
    out = jax.block_until_ready(out)

    # Reference in plain JAX, in the ORIGINAL op order
    # (permute -> expand -> select -> +1), with identical RNG-drawn parameters.
    np.random.seed(0)
    r = jnp.asarray(x_np)
    perm = get_permute_parameter(r.ndim)
    r = jnp.transpose(r, perm)
    axis_num = int(np.random.randint(0, 2))
    v_expand = get_expand_parameter(tuple(r.shape), axis_num)
    r = jnp.broadcast_to(r, v_expand)
    dim, index = get_select_parameter(tuple(r.shape))
    if r.ndim != 0:
        r = jnp.take(r, index, axis=dim)
    ref = r + 1.0

    assert out.shape == ref.shape, (out.shape, ref.shape)
    np.testing.assert_allclose(np.asarray(out), np.asarray(ref), rtol=1e-6, atol=1e-6)

    print("KERNEL_OK")
</pallas_src>

<mosaic_0001>
module attributes {stable_mosaic.version = 11 : i64} {
  func.func @_add_one_kernel(%arg0: memref<1x2048xf32, #tpu.memory_space<vmem>>, %arg1: memref<1x2048xf32, #tpu.memory_space<vmem>>) attributes {dimension_semantics = [], scalar_prefetch = 0 : i64, scratch_operands = 0 : i64, tpu.core_type = #tpu.core_type<tc>} {
    %c0 = arith.constant 0 : index
    %c0_0 = arith.constant 0 : index
    %0 = vector.load %arg0[%c0, %c0_0] : memref<1x2048xf32, #tpu.memory_space<vmem>>, vector<1x2048xf32>
    %cst = arith.constant 1.000000e+00 : f32
    %1 = vector.broadcast %cst : f32 to vector<1x2048xf32>
    %2 = arith.addf %0, %1 : vector<1x2048xf32>
    %c0_1 = arith.constant 0 : index
    %c0_2 = arith.constant 0 : index
    %3 = vector.load %arg1[%c0_1, %c0_2] : memref<1x2048xf32, #tpu.memory_space<vmem>>, vector<1x2048xf32>
    tpu.vector_store %arg1[%c0_1, %c0_2], %2 {strides = array<i32>} : memref<1x2048xf32, #tpu.memory_space<vmem>>, vector<1x2048xf32>,
    return
  }
}

</mosaic_0001>

<bundles_post_ra>
// kernel: _view_chain1_device.1
= control target key start
LH: loop header
LB: loop body
LE: loop exit
PB: predicated region body
PF: predicated region fallthrough
CT: control target
= control target key end

     0   :  { %s40_s0 = inlined_call_operand.vmem [shape: f32[1,2048], index: 0, kind: input, shape index: {}, may-alias: {0,1}]   ;;  %s41_s1 = inlined_call_operand.vmem [shape: f32[1,2048], index: 1, kind: output, shape index: {}, may-alias: {0,1}]  }
   0x1   :  { %v8_v0 = vld [vmem:[%s40_s0] sm:$0xff]  ;;  %v9_v1 = vld [vmem:[%s40_s0 + $0x8] sm:$0xff] }
   0x2   :  { %v10_v2 = vadd.f32 1.0, %v8_v0  ;;  %v11_v3 = vadd.f32 1.0, %v9_v1 }
   0x4   :  { %12 = vst [vmem:[%s41_s1] sm:$0xff] %v10_v2  ;;  %13 = vst [vmem:[%s41_s1 + $0x8] sm:$0xff] %v11_v3 }

</bundles_post_ra>
